<compile_context>
chip_gen: v7x
topology: tpu7x:2x2x1
jax: 0.10.0
libtpu: 0.0.40
codegen_flags: <defaults>
</compile_context>

<pallas_src>
import jax
import jax.numpy as jnp
from jax.experimental import pallas as pl
from jax.experimental.pallas import tpu as pltpu


def _round_up(x, m):
    return ((x + m - 1) // m) * m


def encoder_kernel(nvalid_ref,                      # SMEM: (1,) int32, real batch size
                   mask_ref, feats_ref, w_ref, bn_ref,   # inputs
                   out_ref,                         # output
                   agg_acc, deg_acc):               # VMEM scratch
    n = pl.program_id(0)
    n_last = pl.num_programs(0) - 1

    @pl.when(n == 0)
    def _init():
        agg_acc[...] = jnp.zeros_like(agg_acc)
        deg_acc[...] = jnp.zeros_like(deg_acc)

    # --- mean aggregator, accumulated over N tiles -----------------------
    mask = mask_ref[...]                            # [B_pad, TN]  bf16 (0/1)
    feats = feats_ref[...]                          # [TN, F_pad]  bf16
    agg_acc[...] += jnp.dot(mask, feats, preferred_element_type=jnp.float32)
    deg_acc[...] += jnp.sum(mask.astype(jnp.float32), axis=-1, keepdims=True)

    # --- finalize: projection + BatchNorm1d + LeakyReLU ------------------
    @pl.when(n == n_last)
    def _finalize():
        inv_deg = pl.reciprocal(jnp.maximum(deg_acc[...], 1.0), approx=True)
        neigh = (agg_acc[...] * inv_deg).astype(jnp.bfloat16)       # [B_pad, F_pad]

        x = jnp.dot(neigh, w_ref[...],
                    preferred_element_type=jnp.float32)             # [B_pad, E_pad] f32

        # BatchNorm1d (training-mode batch stats, biased var, eps=1e-5),
        # computed over the valid (non-padded) rows only.
        n_valid = nvalid_ref[0]
        inv_b = 1.0 / n_valid.astype(jnp.float32)
        row_ids = jax.lax.broadcasted_iota(jnp.int32, x.shape, 0)
        row_mask = (row_ids < n_valid).astype(jnp.float32)

        mean = jnp.sum(x * row_mask, axis=0, keepdims=True) * inv_b          # [1, E_pad]
        var = jnp.sum(((x - mean) ** 2) * row_mask, axis=0, keepdims=True) * inv_b
        xhat = (x - mean) * jax.lax.rsqrt(var + 1e-5)

        bn = bn_ref[...]                             # [2, E_pad]: row0=gamma, row1=beta
        y = xhat * bn[0:1, :] + bn[1:2, :]

        # LeakyReLU (default negative_slope = 0.01)
        out_ref[...] = jnp.where(y >= 0.0, y, 0.01 * y)


def encoder_forward(adj_mask, raw_features, weight, gamma, beta, *, tile_n=128):
    """adj_mask [B, N] (0/1), raw_features [N, F], weight [F, E], gamma/beta [1, E]."""
    B, N = adj_mask.shape
    Nf, F = raw_features.shape
    Fw, E = weight.shape
    assert N == Nf and F == Fw

    # Lane/MXU-friendly padded shapes.
    B_pad = _round_up(B, 128)
    N_pad = _round_up(N, tile_n)
    F_pad = _round_up(F, 128)
    E_pad = _round_up(E, 128)

    # bf16 MXU inputs (f32 accumulation inside the kernel).
    mask_p = jnp.zeros((B_pad, N_pad), jnp.bfloat16).at[:B, :N].set(
        adj_mask.astype(jnp.bfloat16))
    feats_p = jnp.zeros((N_pad, F_pad), jnp.bfloat16).at[:N, :F].set(
        raw_features.astype(jnp.bfloat16))
    w_p = jnp.zeros((F_pad, E_pad), jnp.bfloat16).at[:F, :E].set(
        weight.astype(jnp.bfloat16))

    # Pack gamma/beta into one lane-dense buffer (kept f32).
    bn_p = jnp.zeros((2, E_pad), jnp.float32)
    bn_p = bn_p.at[0, :E].set(gamma.reshape(-1).astype(jnp.float32))
    bn_p = bn_p.at[1, :E].set(beta.reshape(-1).astype(jnp.float32))

    n_valid = jnp.array([B], jnp.int32)

    grid = (N_pad // tile_n,)
    out_padded = pl.pallas_call(
        encoder_kernel,
        out_shape=jax.ShapeDtypeStruct((B_pad, E_pad), jnp.float32),
        grid_spec=pltpu.PrefetchScalarGridSpec(
            num_scalar_prefetch=1,
            grid=grid,
            in_specs=[
                pl.BlockSpec((B_pad, tile_n), lambda n, nv: (0, n)),   # adjacency mask tile
                pl.BlockSpec((tile_n, F_pad), lambda n, nv: (n, 0)),   # feature tile
                pl.BlockSpec((F_pad, E_pad), lambda n, nv: (0, 0)),    # weight (resident)
                pl.BlockSpec((2, E_pad), lambda n, nv: (0, 0)),        # gamma/beta (resident)
            ],
            out_specs=pl.BlockSpec((B_pad, E_pad), lambda n, nv: (0, 0)),
            scratch_shapes=[
                pltpu.VMEM((B_pad, F_pad), jnp.float32),   # aggregation accumulator
                pltpu.VMEM((B_pad, 1), jnp.float32),       # degree accumulator
            ],
        ),
        compiler_params=pltpu.CompilerParams(
            dimension_semantics=("arbitrary",),            # N is a reduction axis
            vmem_limit_bytes=32 * 1024 * 1024,
        ),
    )(n_valid, mask_p, feats_p, w_p, bn_p)

    return out_padded[:B, :E]


def xavier_uniform(key, shape):
    fan_in, fan_out = shape
    bound = (6.0 / (fan_in + fan_out)) ** 0.5
    return jax.random.uniform(key, shape, jnp.float32, -bound, bound)


if __name__ == "__main__":
    key = jax.random.PRNGKey(0)
    k_feat, k_adj, k_w = jax.random.split(key, 3)

    # small, module-consistent shapes
    num_nodes = 64        # total nodes in graph
    feature_dim = 32      # feat_dim
    embed_dim = 32        # embed_dim
    batch = 8             # len(nodes)

    raw_features = jax.random.normal(k_feat, (num_nodes, feature_dim), jnp.float32)

    # deterministic adjacency lists for the batch nodes, as a dense 0/1 mask [B, N]
    adj_mask = (jax.random.uniform(k_adj, (batch, num_nodes)) < 0.15).astype(jnp.float32)
    # guarantee every node has at least one neighbor (itself)
    adj_mask = adj_mask.at[jnp.arange(batch), jnp.arange(batch)].set(1.0)

    # parameters (xavier_uniform weight; BN affine defaults gamma=1, beta=0)
    weight = xavier_uniform(k_w, (feature_dim, embed_dim))
    gamma = jnp.ones((1, embed_dim), jnp.float32)
    beta = jnp.zeros((1, embed_dim), jnp.float32)

    out = encoder_forward(adj_mask, raw_features, weight, gamma, beta)
    jax.block_until_ready(out)
    assert out.shape == (batch, embed_dim)

    # pure-JAX reference with matched bf16 matmul-input precision
    mask_bf = adj_mask.astype(jnp.bfloat16).astype(jnp.float32)
    feats_bf = raw_features.astype(jnp.bfloat16).astype(jnp.float32)
    w_bf = weight.astype(jnp.bfloat16).astype(jnp.float32)
    deg = jnp.maximum(mask_bf.sum(-1, keepdims=True), 1.0)
    neigh = (mask_bf @ feats_bf) / deg
    neigh = neigh.astype(jnp.bfloat16).astype(jnp.float32)
    x = neigh @ w_bf
    m = x.mean(0, keepdims=True)
    v = ((x - m) ** 2).mean(0, keepdims=True)
    ref = (x - m) / jnp.sqrt(v + 1e-5) * gamma + beta
    ref = jnp.where(ref >= 0, ref, 0.01 * ref)

    assert jnp.allclose(out, ref, atol=2e-2, rtol=2e-2), float(jnp.max(jnp.abs(out - ref)))
    print("KERNEL_OK")
</pallas_src>

<mosaic_0001>
module attributes {stable_mosaic.version = 11 : i64} {
  func.func @encoder_kernel(%arg0: i32, %arg1: memref<1xi32, #tpu.memory_space<smem>>, %arg2: memref<128x128xbf16, #tpu.memory_space<vmem>>, %arg3: memref<128x128xbf16, #tpu.memory_space<vmem>>, %arg4: memref<128x128xbf16, #tpu.memory_space<vmem>>, %arg5: memref<2x128xf32, #tpu.memory_space<vmem>>, %arg6: memref<128x128xf32, #tpu.memory_space<vmem>>, %arg7: memref<128x128xf32, #tpu.memory_space<vmem>>, %arg8: memref<128x1xf32, #tpu.memory_space<vmem>>) attributes {dimension_semantics = [#tpu.dimension_semantics<arbitrary>], iteration_bounds = array<i64: 1>, scalar_prefetch = 1 : i64, scratch_operands = 2 : i64, tpu.core_type = #tpu.core_type<tc>, window_params = [{transform_indices = @transform_0, window_bounds = array<i64: 128, 128>}, {transform_indices = @transform_1, window_bounds = array<i64: 128, 128>}, {pipeline_mode = #tpu.pipeline_mode<synchronous>, transform_indices = @transform_2, window_bounds = array<i64: 128, 128>}, {pipeline_mode = #tpu.pipeline_mode<synchronous>, transform_indices = @transform_3, window_bounds = array<i64: 2, 128>}, {pipeline_mode = #tpu.pipeline_mode<synchronous>, transform_indices = @transform_4, window_bounds = array<i64: 128, 128>}]} {
    %c0_i32 = arith.constant 0 : i32
    %0 = arith.cmpi eq, %arg0, %c0_i32 : i32
    %1 = arith.extui %0 : i1 to i32
    %c0_i32_0 = arith.constant 0 : i32
    %2 = arith.cmpi ne, %1, %c0_i32_0 : i32
    scf.if %2 {
      %cst_15 = arith.constant 0.000000e+00 : f32
      %18 = vector.broadcast %cst_15 : f32 to vector<128x128xf32>
      %c0_16 = arith.constant 0 : index
      %c0_17 = arith.constant 0 : index
      %19 = vector.load %arg7[%c0_16, %c0_17] : memref<128x128xf32, #tpu.memory_space<vmem>>, vector<128x128xf32>
      tpu.vector_store %arg7[%c0_16, %c0_17], %18 {strides = array<i32>} : memref<128x128xf32, #tpu.memory_space<vmem>>, vector<128x128xf32>,
      %cst_18 = arith.constant 0.000000e+00 : f32
      %20 = vector.broadcast %cst_18 : f32 to vector<128x1xf32>
      %c0_19 = arith.constant 0 : index
      %c0_20 = arith.constant 0 : index
      %21 = vector.load %arg8[%c0_19, %c0_20] : memref<128x1xf32, #tpu.memory_space<vmem>>, vector<128x1xf32>
      tpu.vector_store %arg8[%c0_19, %c0_20], %20 {strides = array<i32>} : memref<128x1xf32, #tpu.memory_space<vmem>>, vector<128x1xf32>,
    } else {
    }
    %c0 = arith.constant 0 : index
    %c0_1 = arith.constant 0 : index
    %3 = vector.load %arg2[%c0, %c0_1] : memref<128x128xbf16, #tpu.memory_space<vmem>>, vector<128x128xbf16>
    %c0_2 = arith.constant 0 : index
    %c0_3 = arith.constant 0 : index
    %4 = vector.load %arg3[%c0_2, %c0_3] : memref<128x128xbf16, #tpu.memory_space<vmem>>, vector<128x128xbf16>
    %c0_4 = arith.constant 0 : index
    %c0_5 = arith.constant 0 : index
    %5 = vector.load %arg7[%c0_4, %c0_5] : memref<128x128xf32, #tpu.memory_space<vmem>>, vector<128x128xf32>
    %cst = arith.constant dense<0.000000e+00> : vector<128x128xf32>
    %6 = tpu.matmul %3, %4, %cst {dimension_numbers = #tpu.dot_dimension_numbers<[1], [0], [0], [1], [0, 0, 1, 1], [], []>} : vector<128x128xbf16>, vector<128x128xbf16>, vector<128x128xf32> -> vector<128x128xf32>
    %7 = arith.addf %5, %6 : vector<128x128xf32>
    %c0_6 = arith.constant 0 : index
    %c0_7 = arith.constant 0 : index
    %8 = vector.load %arg7[%c0_6, %c0_7] : memref<128x128xf32, #tpu.memory_space<vmem>>, vector<128x128xf32>
    tpu.vector_store %arg7[%c0_6, %c0_7], %7 {strides = array<i32>} : memref<128x128xf32, #tpu.memory_space<vmem>>, vector<128x128xf32>,
    %c0_8 = arith.constant 0 : index
    %c0_9 = arith.constant 0 : index
    %9 = vector.load %arg8[%c0_8, %c0_9] : memref<128x1xf32, #tpu.memory_space<vmem>>, vector<128x1xf32>
    %10 = arith.extf %3 : vector<128x128xbf16> to vector<128x128xf32>
    %cst_10 = arith.constant dense<0.000000e+00> : vector<128xf32>
    %11 = vector.multi_reduction <add>, %10, %cst_10 [1] : vector<128x128xf32> to vector<128xf32>
    %12 = vector.shape_cast %11 : vector<128xf32> to vector<128x1xf32>
    %13 = arith.addf %9, %12 : vector<128x1xf32>
    %c0_11 = arith.constant 0 : index
    %c0_12 = arith.constant 0 : index
    %14 = vector.load %arg8[%c0_11, %c0_12] : memref<128x1xf32, #tpu.memory_space<vmem>>, vector<128x1xf32>
    tpu.vector_store %arg8[%c0_11, %c0_12], %13 {strides = array<i32>} : memref<128x1xf32, #tpu.memory_space<vmem>>, vector<128x1xf32>,
    %c0_i32_13 = arith.constant 0 : i32
    %15 = arith.cmpi eq, %arg0, %c0_i32_13 : i32
    %16 = arith.extui %15 : i1 to i32
    %c0_i32_14 = arith.constant 0 : i32
    %17 = arith.cmpi ne, %16, %c0_i32_14 : i32
    scf.if %17 {
      %c0_15 = arith.constant 0 : index
      %c0_16 = arith.constant 0 : index
      %18 = vector.load %arg8[%c0_15, %c0_16] : memref<128x1xf32, #tpu.memory_space<vmem>>, vector<128x1xf32>
      %cst_17 = arith.constant 1.000000e+00 : f32
      %19 = vector.broadcast %cst_17 : f32 to vector<128x1xf32>
      %20 = arith.maximumf %18, %19 : vector<128x1xf32>
      %21 = tpu.reciprocal %20 {approx = true} : vector<128x1xf32> -> vector<128x1xf32>
      %c0_18 = arith.constant 0 : index
      %c0_19 = arith.constant 0 : index
      %22 = vector.load %arg7[%c0_18, %c0_19] : memref<128x128xf32, #tpu.memory_space<vmem>>, vector<128x128xf32>
      %23 = vector.broadcast %21 : vector<128x1xf32> to vector<128x128xf32>
      %24 = arith.mulf %22, %23 : vector<128x128xf32>
      %25 = arith.truncf %24 : vector<128x128xf32> to vector<128x128xbf16>
      %c0_20 = arith.constant 0 : index
      %c0_21 = arith.constant 0 : index
      %26 = vector.load %arg4[%c0_20, %c0_21] : memref<128x128xbf16, #tpu.memory_space<vmem>>, vector<128x128xbf16>
      %cst_22 = arith.constant dense<0.000000e+00> : vector<128x128xf32>
      %27 = tpu.matmul %25, %26, %cst_22 {dimension_numbers = #tpu.dot_dimension_numbers<[1], [0], [0], [1], [0, 0, 1, 1], [], []>} : vector<128x128xbf16>, vector<128x128xbf16>, vector<128x128xf32> -> vector<128x128xf32>
      %c0_23 = arith.constant 0 : index
      %28 = memref.load %arg1[%c0_23] : memref<1xi32, #tpu.memory_space<smem>>
      %29 = arith.sitofp %28 : i32 to f32
      %cst_24 = arith.constant 1.000000e+00 : f32
      %30 = arith.divf %cst_24, %29 : f32
      %31 = tpu.iota {dimensions = array<i32: 0>} : vector<128x128xi32>
      %32 = vector.broadcast %28 : i32 to vector<128x128xi32>
      %33 = arith.cmpi slt, %31, %32 : vector<128x128xi32>
      %34 = arith.extui %33 : vector<128x128xi1> to vector<128x128xi32>
      %35 = arith.sitofp %34 : vector<128x128xi32> to vector<128x128xf32>
      %36 = arith.mulf %27, %35 : vector<128x128xf32>
      %cst_25 = arith.constant dense<0.000000e+00> : vector<128xf32>
      %37 = vector.multi_reduction <add>, %36, %cst_25 [0] : vector<128x128xf32> to vector<128xf32>
      %38 = vector.shape_cast %37 : vector<128xf32> to vector<1x128xf32>
      %39 = vector.broadcast %30 : f32 to vector<1x128xf32>
      %40 = arith.mulf %38, %39 : vector<1x128xf32>
      %41 = vector.broadcast %40 : vector<1x128xf32> to vector<128x128xf32>
      %42 = arith.subf %27, %41 : vector<128x128xf32>
      %43 = arith.mulf %42, %42 : vector<128x128xf32>
      %44 = arith.mulf %43, %35 : vector<128x128xf32>
      %cst_26 = arith.constant dense<0.000000e+00> : vector<128xf32>
      %45 = vector.multi_reduction <add>, %44, %cst_26 [0] : vector<128x128xf32> to vector<128xf32>
      %46 = vector.shape_cast %45 : vector<128xf32> to vector<1x128xf32>
      %47 = vector.broadcast %30 : f32 to vector<1x128xf32>
      %48 = arith.mulf %46, %47 : vector<1x128xf32>
      %49 = vector.broadcast %40 : vector<1x128xf32> to vector<128x128xf32>
      %50 = arith.subf %27, %49 : vector<128x128xf32>
      %cst_27 = arith.constant 9.99999974E-6 : f32
      %51 = vector.broadcast %cst_27 : f32 to vector<1x128xf32>
      %52 = arith.addf %48, %51 : vector<1x128xf32>
      %53 = math.rsqrt %52 : vector<1x128xf32>
      %54 = vector.broadcast %53 : vector<1x128xf32> to vector<128x128xf32>
      %55 = arith.mulf %50, %54 : vector<128x128xf32>
      %c0_28 = arith.constant 0 : index
      %c0_29 = arith.constant 0 : index
      %56 = vector.load %arg5[%c0_28, %c0_29] : memref<2x128xf32, #tpu.memory_space<vmem>>, vector<2x128xf32>
      %57 = vector.extract_strided_slice %56 {offsets = [0, 0], sizes = [1, 128], strides = [1, 1]} : vector<2x128xf32> to vector<1x128xf32>
      %58 = vector.broadcast %57 : vector<1x128xf32> to vector<128x128xf32>
      %59 = arith.mulf %55, %58 : vector<128x128xf32>
      %60 = vector.extract_strided_slice %56 {offsets = [1, 0], sizes = [1, 128], strides = [1, 1]} : vector<2x128xf32> to vector<1x128xf32>
      %61 = vector.broadcast %60 : vector<1x128xf32> to vector<128x128xf32>
      %62 = arith.addf %59, %61 : vector<128x128xf32>
      %cst_30 = arith.constant 0.000000e+00 : f32
      %63 = vector.broadcast %cst_30 : f32 to vector<128x128xf32>
      %64 = arith.cmpf oge, %62, %63 : vector<128x128xf32>
      %cst_31 = arith.constant 0.00999999977 : f32
      %65 = vector.broadcast %cst_31 : f32 to vector<128x128xf32>
      %66 = arith.mulf %65, %62 : vector<128x128xf32>
      %67 = arith.select %64, %62, %66 : vector<128x128xi1>, vector<128x128xf32>
      %c0_32 = arith.constant 0 : index
      %c0_33 = arith.constant 0 : index
      %68 = vector.load %arg6[%c0_32, %c0_33] : memref<128x128xf32, #tpu.memory_space<vmem>>, vector<128x128xf32>
      tpu.vector_store %arg6[%c0_32, %c0_33], %67 {strides = array<i32>} : memref<128x128xf32, #tpu.memory_space<vmem>>, vector<128x128xf32>,
    } else {
    }
    return
  }
  func.func @transform_0(%arg0: i32, %arg1: memref<1xi32, #tpu.memory_space<smem>>) -> (i32, i32) {
    %c0_i32 = arith.constant 0 : i32
    %c0_i32_0 = arith.constant 0 : i32
    return %c0_i32, %arg0 : i32, i32
  }
  func.func @transform_1(%arg0: i32, %arg1: memref<1xi32, #tpu.memory_space<smem>>) -> (i32, i32) {
    %c0_i32 = arith.constant 0 : i32
    %c0_i32_0 = arith.constant 0 : i32
    return %arg0, %c0_i32 : i32, i32
  }
  func.func @transform_2(%arg0: i32, %arg1: memref<1xi32, #tpu.memory_space<smem>>) -> (i32, i32) {
    %c0_i32 = arith.constant 0 : i32
    %c0_i32_0 = arith.constant 0 : i32
    %c0_i32_1 = arith.constant 0 : i32
    return %c0_i32, %c0_i32_0 : i32, i32
  }
  func.func @transform_3(%arg0: i32, %arg1: memref<1xi32, #tpu.memory_space<smem>>) -> (i32, i32) {
    %c0_i32 = arith.constant 0 : i32
    %c0_i32_0 = arith.constant 0 : i32
    %c0_i32_1 = arith.constant 0 : i32
    return %c0_i32, %c0_i32_0 : i32, i32
  }
  func.func @transform_4(%arg0: i32, %arg1: memref<1xi32, #tpu.memory_space<smem>>) -> (i32, i32) {
    %c0_i32 = arith.constant 0 : i32
    %c0_i32_0 = arith.constant 0 : i32
    %c0_i32_1 = arith.constant 0 : i32
    return %c0_i32, %c0_i32_0 : i32, i32
  }
}

</mosaic_0001>

<bundles_post_ra>
// kernel: tpu_custom_call.1
= control target key start
LH: loop header
LB: loop body
LE: loop exit
PB: predicated region body
PF: predicated region fallthrough
CT: control target
= control target key end

     0   :  { %11 = vsyncpa [#allocation7], 0  ;;  %s1863_s0 = inlined_call_operand.<no memory space> [shape: s32[1], index: 0, kind: input, shape index: {}]   ;;  %s1864_s1 = inlined_call_operand.hbm [shape: bf16[128,128], index: 1, kind: input, shape index: {}]   ;;  %s1865_s2 = inlined_call_operand.hbm [shape: bf16[128,128], index: 2, kind: input, shape index: {}]   ;;  %s1866_s3 = inlined_call_operand.hbm [shape: bf16[128,128], index: 3, kind: input, shape index: {}]   ;;  %s1867_s4 = inlined_call_operand.vmem [shape: f32[2,128], index: 4, kind: input, shape index: {}]   ;;  %s1868_s5 = inlined_call_operand.hbm [shape: f32[128,128], index: 5, kind: output, shape index: {}]  }
   0x1   :  { %12 = vsyncpa [#allocation10], 0 }
   0x2   :  { %13 = vsyncpa [#allocation8], 0  ;;  %s1434_s18 = smov [#allocation9]   ;;  %s1435_s20 = smov [#allocation6]  }
   0x3   :  { %s31_s19 = sshll.u32 %s1434_s18, 4  ;;  %s19_s21 = sshll.u32 %s1435_s20, 4  ;;  %s32_s19 = int_to_ptr.vmem [resolvable:$true] %s31_s19  ;;  %s1474_s21 = int_to_ptr.vmem [resolvable:$true] %s19_s21 }
   0x4   :  { %s1340_s24 = scalar_lea.hbm %s1865_s2, 1024 }
   0x5   :  { %p1341_p0 = scmp.ne.s32.totalorder %s1865_s2, %s1340_s24  ;;  %p1344_p1 = scmp.lt.u32.totalorder %s1340_s24, %s1865_s2 }
   0x7   :  { %p1346_p2 = pnand %p1344_p1, %p1341_p0 }
   0x9   :  { %1349 = shalt.err (!%p1346_p2)
}
   0xa   :  { %s1350_s29 = scalar_lea.vmem %s32_s19, 1024  ;;  %p1355_p4 = scmp.lt.s32.totalorder %s32_s19, %s32_s19 }
   0xb   :  { %p1351_p3 = scmp.ne.s32.totalorder %s32_s19, %s1350_s29  ;;  %p1356_p5 = scmp.lt.s32.totalorder %s1350_s29, %s1350_s29 }
   0xd   :  { %p1357_p6 = por %p1356_p5, %p1355_p4 }
   0xf   :  { %p1358_p7 = pnand %p1357_p6, %p1351_p3 }
  0x11   :  { %1361 = shalt.err (!%p1358_p7)
}
  0x12   :  { %s1436_s30 = smov 64   ;;  %s1437_s6 = smov 4  }
  0x13   :  { %37 = dma.hbm_to_vmem [thread:$0]  %s1865_s2, 1024, %s32_s19, [#allocation10], %s1436_s30, %s1436_s30, %s1437_s6  }
  0x14   :  { %s1362_s11 = scalar_lea.hbm %s1864_s1, 1024 }
  0x15   :  { %p1363_p8 = scmp.ne.s32.totalorder %s1864_s1, %s1362_s11  ;;  %p1366_p9 = scmp.lt.u32.totalorder %s1362_s11, %s1864_s1 }
  0x17   :  { %p1368_p10 = pnand %p1366_p9, %p1363_p8 }
  0x19   :  { %1371 = shalt.err (!%p1368_p10)
}
  0x1a   :  { %s1372_s16 = scalar_lea.vmem %s1474_s21, 1024  ;;  %p1377_p12 = scmp.lt.s32.totalorder %s1474_s21, %s1474_s21 }
  0x1b   :  { %p1373_p11 = scmp.ne.s32.totalorder %s1474_s21, %s1372_s16  ;;  %p1378_p13 = scmp.lt.s32.totalorder %s1372_s16, %s1372_s16 }
  0x1d   :  { %p1379_p0 = por %p1378_p13, %p1377_p12 }
  0x1f   :  { %p1380_p1 = pnand %p1379_p0, %p1373_p11 }
  0x21   :  { %1383 = shalt.err (!%p1380_p1)
}
  0x22   :  { %25 = dma.hbm_to_vmem [thread:$0]  %s1864_s1, 1024, %s1474_s21, [#allocation7], %s1436_s30, %s1436_s30, %s1437_s6  }
  0x23   :  { %s1438_s18 = smov [#allocation11]   ;;  %s1384_s23 = scalar_lea.hbm %s1866_s3, 1024 }
  0x24   :  { %s43_s19 = sshll.u32 %s1438_s18, 4  ;;  %p1385_p2 = scmp.ne.s32.totalorder %s1866_s3, %s1384_s23  ;;  %s44_s19 = int_to_ptr.vmem [resolvable:$true] %s43_s19 }
  0x25   :  { %p1388_p3 = scmp.lt.u32.totalorder %s1384_s23, %s1866_s3 }
  0x27   :  { %p1390_p4 = pnand %p1388_p3, %p1385_p2 }
  0x29   :  { %1393 = shalt.err (!%p1390_p4)
}
  0x2a   :  { %s1394_s28 = scalar_lea.vmem %s44_s19, 1024  ;;  %p1399_p6 = scmp.lt.s32.totalorder %s44_s19, %s44_s19 }
  0x2b   :  { %p1395_p5 = scmp.ne.s32.totalorder %s44_s19, %s1394_s28  ;;  %p1400_p7 = scmp.lt.s32.totalorder %s1394_s28, %s1394_s28 }
  0x2d   :  { %p1401_p8 = por %p1400_p7, %p1399_p6 }
  0x2f   :  { %p1402_p9 = pnand %p1401_p8, %p1395_p5 }
  0x31   :  { %1405 = shalt.err (!%p1402_p9)
}
  0x32   :  { %49 = dma.hbm_to_vmem [thread:$0]  %s1866_s3, 1024, %s44_s19, [#allocation10], %s1436_s30, %s1436_s30, %s1437_s6  }
  0x33   :  { %1428 = dma.done.wait [#allocation7], 1024  }
  0x34   :  { %1429 = vsyncadd [#allocation7], 4294966272 }
  0x35   :  { %1430 = dma.done.wait [#allocation10], 2048  }
  0x36   :  { %1431 = vsyncadd [#allocation10], 4294965248  ;;  %vm82_vm0 = vcmask 7168   ;;  %v1439_v0 = vmov 0.0   ;;  %v1558_v1 = vld [vmem:[#allocation6 + $0x8] sm:$0xff]   ;;  %v99_v2 = vld [vmem:[#allocation6] sm:$0xff]   ;;  %s802_s30 = scvt.s32.f32 %s1863_s0 }
  0x37   :  { %85 = vst.msk [vmem:[#allocation3 + $0x10] sm:$0xff] %vm82_vm0, %v1439_v0  ;;  %83 = vst.msk [vmem:[#allocation3] sm:$0xff] %vm82_vm0, %v1439_v0  ;;  %v390_v3 = vunpack.c.l.bf16 %v1558_v1  ;;  %v388_v4 = vunpack.c.l.bf16 %v99_v2  ;;  %v104_v5 = vld [vmem:[#allocation6 + $0x10] sm:$0xff]   ;;  %v391_v6 = vunpack.c.h.bf16 %v1558_v1  ;;  %v389_v7 = vunpack.c.h.bf16 %v99_v2  ;;  %v1279_v8 = vld [vmem:[#allocation9] sm:$0xff]   ;;  %1210 = vmatprep.mubr.bf16.mxu0 %v99_v2 }
  0x38   :  { %84 = vst.msk [vmem:[#allocation3 + $0x8] sm:$0xff] %vm82_vm0, %v1439_v0  ;;  %86 = vst.msk [vmem:[#allocation3 + $0x18] sm:$0xff] %vm82_vm0, %v1439_v0  ;;  %v1280_v9 = vld [vmem:[#allocation9 + $0x8] sm:$0xff]   ;;  %1194 = vmatprep.subr.bf16.mxu0 %v1279_v8  ;;  %v393_v10 = vunpack.c.h.bf16 %v104_v5  ;;  %v106_v11 = vld [vmem:[#allocation6 + $0x18] sm:$0xff]   ;;  %v392_v12 = vunpack.c.l.bf16 %v104_v5  ;;  %v1440_v33 = vmov 0  }
  0x39   :  { %87 = vst.msk [vmem:[#allocation3 + $0x20] sm:$0xff] %vm82_vm0, %v1439_v0  ;;  %88 = vst.msk [vmem:[#allocation3 + $0x28] sm:$0xff] %vm82_vm0, %v1439_v0  ;;  %408 = vadd.xlane.f32.xlu1 %v390_v3  ;;  %404 = vadd.xlane.f32.xlu0 %v388_v4  ;;  %v1281_v13 = vld [vmem:[#allocation9 + $0x10] sm:$0xff]   ;;  %v108_v14 = vld [vmem:[#allocation6 + $0x20] sm:$0xff]   ;;  %v395_v16 = vunpack.c.h.bf16 %v106_v11  ;;  %v394_v17 = vunpack.c.l.bf16 %v106_v11 }
  0x3a   :  { %89 = vst.msk [vmem:[#allocation3 + $0x30] sm:$0xff] %vm82_vm0, %v1439_v0  ;;  %90 = vst.msk [vmem:[#allocation3 + $0x38] sm:$0xff] %vm82_vm0, %v1439_v0  ;;  %1195 = vmatpush3.bf16.msra.mxu0 %v1279_v8  ;;  %v1282_v15 = vld [vmem:[#allocation9 + $0x18] sm:$0xff]   ;;  %v397_v18 = vunpack.c.h.bf16 %v108_v14  ;;  %v396_v19 = vunpack.c.l.bf16 %v108_v14  ;;  %v110_v20 = vld [vmem:[#allocation6 + $0x28] sm:$0xff]   ;;  %1270 = vset.pattern.permute.xlu0 %v1440_v33 }
  0x3b   :  { %91 = vst.msk [vmem:[#allocation3 + $0x40] sm:$0xff] %vm82_vm0, %v1439_v0  ;;  %92 = vst.msk [vmem:[#allocation3 + $0x48] sm:$0xff] %vm82_vm0, %v1439_v0  ;;  %1196 = vmatprep.subr.bf16.mxu0 %v1280_v9  ;;  %v1283_v21 = vld [vmem:[#allocation9 + $0x20] sm:$0xff]   ;;  %v399_v22 = vunpack.c.h.bf16 %v110_v20  ;;  %v398_v23 = vunpack.c.l.bf16 %v110_v20  ;;  %v112_v24 = vld [vmem:[#allocation6 + $0x30] sm:$0xff]   ;;  %1271 = vset.pattern.permute.xlu1 %v1440_v33 }
  0x3c   :  { %93 = vst.msk [vmem:[#allocation3 + $0x50] sm:$0xff] %vm82_vm0, %v1439_v0  ;;  %94 = vst.msk [vmem:[#allocation3 + $0x58] sm:$0xff] %vm82_vm0, %v1439_v0  ;;  %v1284_v25 = vld [vmem:[#allocation9 + $0x28] sm:$0xff]   ;;  %v401_v26 = vunpack.c.h.bf16 %v112_v24  ;;  %v400_v27 = vunpack.c.l.bf16 %v112_v24  ;;  %v114_v28 = vld [vmem:[#allocation6 + $0x38] sm:$0xff]  }
  0x3d   :  { %95 = vst.msk [vmem:[#allocation3 + $0x60] sm:$0xff] %vm82_vm0, %v1439_v0  ;;  %96 = vst.msk [vmem:[#allocation3 + $0x68] sm:$0xff] %vm82_vm0, %v1439_v0  ;;  %410 = vadd.xlane.f32.xlu1 %v391_v6  ;;  %406 = vadd.xlane.f32.xlu0 %v389_v7  ;;  %v1285_v29 = vld [vmem:[#allocation9 + $0x30] sm:$0xff]   ;;  %v403_v30 = vunpack.c.h.bf16 %v114_v28  ;;  %v402_v31 = vunpack.c.l.bf16 %v114_v28  ;;  %v1286_v32 = vld [vmem:[#allocation9 + $0x38] sm:$0xff]  }
  0x3e   :  { %97 = vst.msk [vmem:[#allocation3 + $0x70] sm:$0xff] %vm82_vm0, %v1439_v0  ;;  %98 = vst.msk [vmem:[#allocation3 + $0x78] sm:$0xff] %vm82_vm0, %v1439_v0  ;;  %1197 = vmatpush3.bf16.msra.mxu0 %v1280_v9  ;;  %v1288_v34 = vld [vmem:[#allocation11] sm:$0xff]   ;;  %v1289_v35 = vld [vmem:[#allocation11 + $0x8] sm:$0xff]  }
  0x3f   :  { %1198 = vmatprep.subr.bf16.mxu0 %v1281_v13  ;;  %1226 = vmatprep.subr.bf16.mxu1 %v1288_v34  ;;  %v1290_v36 = vld [vmem:[#allocation11 + $0x10] sm:$0xff]   ;;  %v1291_v37 = vld [vmem:[#allocation11 + $0x18] sm:$0xff]   ;;  %v372_v39 = vld [vmem:[#allocation3] sm:$0xff] }
  0x40   :  { %1227 = vmatpush3.bf16.msra.mxu1 %v1288_v34  ;;  %v374_v38 = vld [vmem:[#allocation3 + $0x10] sm:$0xff]  ;;  %v375_v44 = vld [vmem:[#allocation3 + $0x18] sm:$0xff]  ;;  %v373_v45 = vld [vmem:[#allocation3 + $0x8] sm:$0xff] }
  0x41   :  { %414 = vadd.xlane.f32.xlu1 %v393_v10  ;;  %412 = vadd.xlane.f32.xlu0 %v392_v12  ;;  %v377_v50 = vld [vmem:[#allocation3 + $0x28] sm:$0xff]  ;;  %v376_v51 = vld [vmem:[#allocation3 + $0x20] sm:$0xff]  ;;  %v379_v56 = vld [vmem:[#allocation3 + $0x38] sm:$0xff] }
  0x42   :  { %1199 = vmatpush3.bf16.msra.mxu0 %v1281_v13  ;;  %1228 = vmatprep.subr.bf16.mxu1 %v1289_v35  ;;  %v378_v57 = vld [vmem:[#allocation3 + $0x30] sm:$0xff]  ;;  %v381_v2 = vld [vmem:[#allocation3 + $0x48] sm:$0xff]  ;;  %v380_v4 = vld [vmem:[#allocation3 + $0x40] sm:$0xff] }
  0x43   :  { %1200 = vmatprep.subr.bf16.mxu0 %v1282_v15  ;;  %v383_v12 = vld [vmem:[#allocation3 + $0x58] sm:$0xff]  ;;  %v382_v13 = vld [vmem:[#allocation3 + $0x50] sm:$0xff]  ;;  %v1293_v33 = vld [vmem:[#allocation11 + $0x28] sm:$0xff]  }
  0x44   :  { %1229 = vmatpush3.bf16.msra.mxu1 %v1289_v35 }
  0x45   :  { %418 = vadd.xlane.f32.xlu1 %v395_v16  ;;  %416 = vadd.xlane.f32.xlu0 %v394_v17 }
  0x46   :  { %1201 = vmatpush3.bf16.msra.mxu0 %v1282_v15  ;;  %1230 = vmatprep.subr.bf16.mxu1 %v1290_v36 }
  0x47   :  { %1202 = vmatprep.subr.bf16.mxu0 %v1283_v21 }
  0x48   :  { %1231 = vmatpush3.bf16.msra.mxu1 %v1290_v36 }
  0x49   :  { %422 = vadd.xlane.f32.xlu1 %v397_v18  ;;  %420 = vadd.xlane.f32.xlu0 %v396_v19 }
  0x4a   :  { %1203 = vmatpush3.bf16.msra.mxu0 %v1283_v21  ;;  %1232 = vmatprep.subr.bf16.mxu1 %v1291_v37  ;;  %v384_v21 = vld [vmem:[#allocation3 + $0x60] sm:$0xff] }
  0x4b   :  { %1204 = vmatprep.subr.bf16.mxu0 %v1284_v25 }
  0x4c   :  { %1233 = vmatpush3.bf16.msra.mxu1 %v1291_v37 }
  0x4d   :  { %426 = vadd.xlane.f32.xlu1 %v399_v22  ;;  %424 = vadd.xlane.f32.xlu0 %v398_v23  ;;  %v1292_v22 = vld [vmem:[#allocation11 + $0x20] sm:$0xff]  }
  0x4e   :  { %1205 = vmatpush3.bf16.msra.mxu0 %v1284_v25  ;;  %1234 = vmatprep.subr.bf16.mxu1 %v1292_v22 }
  0x4f   :  { %1206 = vmatprep.subr.bf16.mxu0 %v1285_v29 }
  0x50   :  { %1235 = vmatpush3.bf16.msra.mxu1 %v1292_v22 }
  0x51   :  { %430 = vadd.xlane.f32.xlu1 %v401_v26  ;;  %428 = vadd.xlane.f32.xlu0 %v400_v27 }
  0x52   :  { %1207 = vmatpush3.bf16.msra.mxu0 %v1285_v29  ;;  %v387_v29 = vld [vmem:[#allocation3 + $0x78] sm:$0xff]  ;;  %1236 = vmatprep.subr.bf16.mxu1 %v1293_v33 }
  0x53   :  { %1208 = vmatprep.subr.bf16.mxu0 %v1286_v32 }
  0x54   :  { %1237 = vmatpush3.bf16.msra.mxu1 %v1293_v33 }
  0x55   :  { %434 = vadd.xlane.f32.xlu1 %v403_v30  ;;  %432 = vadd.xlane.f32.xlu0 %v402_v31 }
  0x56   :  { %1209 = vmatpush3.bf16.msra.mxu0 %v1286_v32  ;;  %v386_v32 = vld [vmem:[#allocation3 + $0x70] sm:$0xff] }
  0x59   :  { %1211 = vmatmul.mubr.bf16.vlgmr.msra.gmra.mrb[0].mxu0 %v1558_v1 }
  0x5a   :  { %1214 = vmatprep.mubr.bf16.mxu0 %v104_v5 }
  0x61   :  { %1215 = vmatmul.mubr.bf16.gmra.mrb[4].mxu0 %v106_v11 }
  0x62   :  { %1218 = vmatprep.mubr.bf16.mxu0 %v108_v14 }
  0x69   :  { %1219 = vmatmul.mubr.bf16.gmra.mrb[8].mxu0 %v110_v20  ;;  %v385_v20 = vld [vmem:[#allocation3 + $0x68] sm:$0xff] }
  0x6a   :  { %1222 = vmatprep.mubr.bf16.mxu0 %v112_v24 }
  0x71   :  { %1223 = vmatmul.mubr.bf16.gmra.mrb[12].mxu0 %v114_v28 }
  0xc6   :  { %v409_v40 = vpop.xlane.xlu1 %408  ;;  %v405_v41 = vpop.xlane.xlu0 %404 }
  0xc7   :  { %v438_v42 = vadd.f32 %v409_v40, %v374_v38  ;;  %v436_v43 = vadd.f32 %v405_v41, %v372_v39 }
  0xc9   :  { %455 = vst.msk [vmem:[#allocation3 + $0x10] sm:$0xff] %vm82_vm0, %v438_v42  ;;  %453 = vst.msk [vmem:[#allocation3] sm:$0xff] %vm82_vm0, %v436_v43 }
  0xca   :  { %v411_v46 = vpop.xlane.xlu1 %410  ;;  %v407_v47 = vpop.xlane.xlu0 %406 }
  0xcb   :  { %v439_v48 = vadd.f32 %v411_v46, %v375_v44  ;;  %v437_v49 = vadd.f32 %v407_v47, %v373_v45  ;;  %v1294_v44 = vld [vmem:[#allocation11 + $0x30] sm:$0xff]  }
  0xcc   :  { %1238 = vmatprep.subr.bf16.mxu1 %v1294_v44 }
  0xcd   :  { %456 = vst.msk [vmem:[#allocation3 + $0x18] sm:$0xff] %vm82_vm0, %v439_v48  ;;  %454 = vst.msk [vmem:[#allocation3 + $0x8] sm:$0xff] %vm82_vm0, %v437_v49  ;;  %1239 = vmatpush3.bf16.msra.mxu1 %v1294_v44 }
  0xce   :  { %v415_v52 = vpop.xlane.xlu1 %414  ;;  %v413_v53 = vpop.xlane.xlu0 %412 }
  0xcf   :  { %v441_v54 = vadd.f32 %v415_v52, %v377_v50  ;;  %v440_v55 = vadd.f32 %v413_v53, %v376_v51  ;;  %v1295_v50 = vld [vmem:[#allocation11 + $0x38] sm:$0xff]  }
  0xd0   :  { %v472_v58 = vld [vmem:[#allocation3] sm:$0xff]  ;;  %v474_v62 = vld [vmem:[#allocation3 + $0x10] sm:$0xff]  ;;  %1240 = vmatprep.subr.bf16.mxu1 %v1295_v50 }
  0xd1   :  { %458 = vst.msk [vmem:[#allocation3 + $0x28] sm:$0xff] %vm82_vm0, %v441_v54  ;;  %457 = vst.msk [vmem:[#allocation3 + $0x20] sm:$0xff] %vm82_vm0, %v440_v55  ;;  %v488_v59 = vmax.f32 %v472_v58, 1.0  ;;  %v490_v6 = vmax.f32 %v474_v62, 1.0  ;;  %1241 = vmatpush3.bf16.msra.mxu1 %v1295_v50 }
  0xd2   :  { %v419_v60 = vpop.xlane.xlu1 %418  ;;  %v417_v61 = vpop.xlane.xlu0 %416 }
  0xd3   :  { %v443_v63 = vadd.f32 %v419_v60, %v379_v56  ;;  %v442_v1 = vadd.f32 %v417_v61, %v378_v57  ;;  %1304 = vrcp.f32 %v488_v59 }
  0xd4   :  { %v473_v3 = vld [vmem:[#allocation3 + $0x8] sm:$0xff]  ;;  %v475_v9 = vld [vmem:[#allocation3 + $0x18] sm:$0xff] }
  0xd5   :  { %460 = vst.msk [vmem:[#allocation3 + $0x38] sm:$0xff] %vm82_vm0, %v443_v63  ;;  %459 = vst.msk [vmem:[#allocation3 + $0x30] sm:$0xff] %vm82_vm0, %v442_v1  ;;  %v489_v5 = vmax.f32 %v473_v3, 1.0  ;;  %v491_v14 = vmax.f32 %v475_v9, 1.0 }
  0xd6   :  { %v423_v7 = vpop.xlane.xlu1 %422  ;;  %v421_v8 = vpop.xlane.xlu0 %420 }
  0xd7   :  { %v445_v10 = vadd.f32 %v423_v7, %v381_v2  ;;  %1306 = vrcp.f32 %v489_v5  ;;  %v444_v11 = vadd.f32 %v421_v8, %v380_v4 }
  0xd8   :  { %1308 = vrcp.f32 %v490_v6  ;;  %v476_v17 = vld [vmem:[#allocation3 + $0x20] sm:$0xff]  ;;  %v477_v27 = vld [vmem:[#allocation3 + $0x28] sm:$0xff] }
  0xd9   :  { %462 = vst.msk [vmem:[#allocation3 + $0x48] sm:$0xff] %vm82_vm0, %v445_v10  ;;  %461 = vst.msk [vmem:[#allocation3 + $0x40] sm:$0xff] %vm82_vm0, %v444_v11  ;;  %1310 = vrcp.f32 %v491_v14  ;;  %v492_v24 = vmax.f32 %v476_v17, 1.0  ;;  %v493_v36 = vmax.f32 %v477_v27, 1.0 }
  0xda   :  { %v427_v15 = vpop.xlane.xlu1 %426  ;;  %v425_v16 = vpop.xlane.xlu0 %424 }
  0xdb   :  { %v447_v18 = vadd.f32 %v427_v15, %v383_v12  ;;  %v446_v19 = vadd.f32 %v425_v16, %v382_v13  ;;  %1312 = vrcp.f32 %v492_v24 }
  0xdc   :  { %v478_v39 = vld [vmem:[#allocation3 + $0x30] sm:$0xff]  ;;  %v479_v47 = vld [vmem:[#allocation3 + $0x38] sm:$0xff] }
  0xdd   :  { %v1305_v23 = vpop.eup %1304  ;;  %464 = vst.msk [vmem:[#allocation3 + $0x58] sm:$0xff] %vm82_vm0, %v447_v18  ;;  %463 = vst.msk [vmem:[#allocation3 + $0x50] sm:$0xff] %vm82_vm0, %v446_v19  ;;  %v494_v46 = vmax.f32 %v478_v39, 1.0  ;;  %v495_v52 = vmax.f32 %v479_v47, 1.0 }
  0xde   :  { %v431_v25 = vpop.xlane.xlu1 %430  ;;  %538 = vperm.xlu0 %1270, %v1305_v23   ;;  %v429_v26 = vpop.xlane.xlu0 %428 }
  0xdf   :  { %v449_v28 = vadd.f32 %v431_v25, %v385_v20  ;;  %v448_v30 = vadd.f32 %v429_v26, %v384_v21 }
  0xe0   :  { %v481_v31 = vld [vmem:[#allocation3 + $0x48] sm:$0xff]  ;;  %v480_v53 = vld [vmem:[#allocation3 + $0x40] sm:$0xff] }
  0xe1   :  { %v1307_v34 = vpop.eup %1306  ;;  %466 = vst.msk [vmem:[#allocation3 + $0x68] sm:$0xff] %vm82_vm0, %v449_v28  ;;  %465 = vst.msk [vmem:[#allocation3 + $0x60] sm:$0xff] %vm82_vm0, %v448_v30  ;;  %v497_v35 = vmax.f32 %v481_v31, 1.0  ;;  %v496_v58 = vmax.f32 %v480_v53, 1.0 }
  0xe2   :  { %v435_v37 = vpop.xlane.xlu1 %434  ;;  %543 = vperm.xlu1 %1271, %v1307_v34   ;;  %v433_v38 = vpop.xlane.xlu0 %432 }
  0xe3   :  { %v1309_v40 = vpop.eup %1308  ;;  %v451_v41 = vadd.f32 %v435_v37, %v387_v29  ;;  %1314 = vrcp.f32 %v497_v35  ;;  %v450_v42 = vadd.f32 %v433_v38, %v386_v32 }
  0xe4   :  { %v483_v43 = vld [vmem:[#allocation3 + $0x58] sm:$0xff]  ;;  %1316 = vrcp.f32 %v493_v36  ;;  %v1311_v48 = vpop.eup %1310  ;;  %v482_v59 = vld [vmem:[#allocation3 + $0x50] sm:$0xff] }
  0xe5   :  { %468 = vst.msk [vmem:[#allocation3 + $0x78] sm:$0xff] %vm82_vm0, %v451_v41  ;;  %467 = vst.msk [vmem:[#allocation3 + $0x70] sm:$0xff] %vm82_vm0, %v450_v42  ;;  %v499_v45 = vmax.f32 %v483_v43, 1.0  ;;  %v1313_v54 = vpop.eup %1312  ;;  %v498_v62 = vmax.f32 %v482_v59, 1.0 }
  0xe6   :  { %548 = vperm.xlu1 %1271, %v1309_v40  }
  0xe7   :  { %1318 = vrcp.f32 %v499_v45 }
  0xe8   :  { %v485_v49 = vld [vmem:[#allocation3 + $0x68] sm:$0xff]  ;;  %1320 = vrcp.f32 %v494_v46  ;;  %v484_v63 = vld [vmem:[#allocation3 + $0x60] sm:$0xff] }
  0xe9   :  { %v501_v51 = vmax.f32 %v485_v49, 1.0  ;;  %v500_v3 = vmax.f32 %v484_v63, 1.0 }
  0xea   :  { %553 = vperm.xlu1 %1271, %v1311_v48  }
  0xeb   :  { %1322 = vrcp.f32 %v501_v51 }
  0xec   :  { %v487_v55 = vld [vmem:[#allocation3 + $0x78] sm:$0xff]  ;;  %1324 = vrcp.f32 %v495_v52  ;;  %v486_v4 = vld [vmem:[#allocation3 + $0x70] sm:$0xff] }
  0xed   :  { %v1315_v56 = vpop.eup %1314  ;;  %v503_v57 = vmax.f32 %v487_v55, 1.0  ;;  %v502_v7 = vmax.f32 %v486_v4, 1.0 }
  0xee   :  { %558 = vperm.xlu1 %1271, %v1313_v54   ;;  %583 = vperm.xlu0 %1270, %v1315_v56   ;;  %v1317_v60 = vpop.eup %1316 }
  0xef   :  { %1326 = vrcp.f32 %v503_v57 }
  0xf0   :  { %1328 = vrcp.f32 %v496_v58 }
  0xf1   :  { %v1319_v61 = vpop.eup %1318  ;;  %1330 = vrcp.f32 %v498_v62 }
  0xf2   :  { %563 = vperm.xlu1 %1271, %v1317_v60   ;;  %593 = vperm.xlu0 %1270, %v1319_v61   ;;  %v1321_v1 = vpop.eup %1320  ;;  %1332 = vrcp.f32 %v500_v3 }
  0xf3   :  { %1334 = vrcp.f32 %v502_v7  ;;  %v806_v7 = vlaneseq }
  0xf5   :  { %v1323_v2 = vpop.eup %1322 }
  0xf6   :  { %568 = vperm.xlu1 %1271, %v1321_v1   ;;  %603 = vperm.xlu0 %1270, %v1323_v2   ;;  %v1325_v5 = vpop.eup %1324 }
  0xf9   :  { %v1327_v6 = vpop.eup %1326 }
  0xfa   :  { %573 = vperm.xlu1 %1271, %v1325_v5   ;;  %613 = vperm.xlu0 %1270, %v1327_v6   ;;  %v1329_v8 = vpop.eup %1328  ;;  %v803_v5 = vstv %s802_s30 }
  0xfb   :  { %v1331_v9 = vpop.eup %1330  ;;  %1336 = vrcp.f32 %v803_v5 }
  0xfc   :  { %v1333_v10 = vpop.eup %1332 }
  0xfd   :  { %v1335_v11 = vpop.eup %1334 }
  0xfe   :  { %578 = vperm.xlu1 %1271, %v1329_v8   ;;  %v1582_v8 = vshrl.u32 %v806_v7, 7 }
 0x100   :  { %v822_v5 = vadd.s32 120, %v1582_v8 }
 0x102   :  { %588 = vperm.xlu1 %1271, %v1331_v9   ;;  %v808_v9 = vadd.s32 8, %v1582_v8 }
 0x105   :  { %v1337_v6 = vpop.eup %1336 }
 0x106   :  { %598 = vperm.xlu1 %1271, %v1333_v10   ;;  %1258 = vpush %v1337_v6  ;;  %v1588_v10 = vstv %s1863_s0 }
 0x107   :  { %vm824_vm1 = vcmp.lt.s32.totalorder %v1582_v8, %v1588_v10  ;;  %vm825_vm2 = vcmp.lt.s32.totalorder %v808_v9, %v1588_v10  ;;  %vm839_vm0 = vcmp.lt.s32.totalorder %v822_v5, %v1588_v10 }
 0x10a   :  { %608 = vperm.xlu1 %1271, %v1335_v11   ;;  %v809_v11 = vadd.s32 16, %v1582_v8 }
 0x10c   :  { %vm826_vm3 = vcmp.lt.s32.totalorder %v809_v11, %v1588_v10 }
 0x12c   :  { %v1212_v12 = vpop.f32.mrb[0].mxu0 }
 0x12d   :  { %v277_v13 = vpop.f32.mrb[1].mxu0 }
 0x12e   :  { %v1213_v14 = vpop.f32.mrb[2].mxu0 }
 0x12f   :  { %v280_v15 = vpop.f32.mrb[3].mxu0 }
 0x134   :  { %v1216_v16 = vpop.f32.mrb[4].mxu0 }
 0x135   :  { %v293_v17 = vpop.f32.mrb[5].mxu0 }
 0x136   :  { %v1217_v18 = vpop.f32.mrb[6].mxu0 }
 0x137   :  { %v296_v19 = vpop.f32.mrb[7].mxu0  ;;  %s1709_s0 = spop %1258 }
 0x13c   :  { %v1220_v20 = vpop.f32.mrb[8].mxu0 }
 0x13d   :  { %v309_v21 = vpop.f32.mrb[9].mxu0 }
 0x13e   :  { %v1221_v22 = vpop.f32.mrb[10].mxu0 }
 0x13f   :  { %v312_v23 = vpop.f32.mrb[11].mxu0 }
 0x144   :  { %v1224_v24 = vpop.f32.mrb[12].mxu0 }
 0x145   :  { %v325_v25 = vpop.f32.mrb[13].mxu0 }
 0x146   :  { %v1225_v26 = vpop.f32.mrb[14].mxu0 }
 0x147   :  { %v328_v27 = vpop.f32.mrb[15].mxu0 }
 0x15d   :  { %v539_v28 = vpop.permute.xlu0 %538 }
 0x15e   :  { %v616_v30 = vmul.f32 %v539_v28, %v277_v13 }
 0x161   :  { %v544_v29 = vpop.permute.xlu1 %543 }
 0x162   :  { %v617_v31 = vmul.f32 %v544_v29, %v280_v15  ;;  %v1601_v15 = vsel %vm824_vm1, 1.0, %v1439_v0  ;;  %v812_v29 = vadd.s32 40, %v1582_v8 }
 0x164   :  { %v632_v32 = vpack.c.bf16 %v617_v31, %v616_v30  ;;  %v813_v30 = vadd.s32 48, %v1582_v8  ;;  %v814_v31 = vadd.s32 56, %v1582_v8  ;;  %vm829_vm6 = vcmp.lt.s32.totalorder %v812_v29, %v1588_v10 }
 0x165   :  { %v549_v33 = vpop.permute.xlu1 %548  ;;  %v1705_v29 = vsel %vm839_vm0, 1.0, %v1439_v0 }
 0x166   :  { %1242 = vmatprep.mubr.bf16.mxu1 %v632_v32  ;;  %v618_v35 = vmul.f32 %v1212_v12, %v549_v33  ;;  %v810_v12 = vadd.s32 24, %v1582_v8  ;;  %vm830_vm7 = vcmp.lt.s32.totalorder %v813_v30, %v1588_v10  ;;  %vm831_vm8 = vcmp.lt.s32.totalorder %v814_v31, %v1588_v10 }
 0x168   :  { %vm827_vm4 = vcmp.lt.s32.totalorder %v810_v12, %v1588_v10 }
 0x169   :  { %v554_v34 = vpop.permute.xlu1 %553 }
 0x16a   :  { %v619_v36 = vmul.f32 %v1213_v14, %v554_v34  ;;  %v815_v34 = vadd.s32 64, %v1582_v8 }
 0x16c   :  { %v633_v37 = vpack.c.bf16 %v619_v36, %v618_v35  ;;  %v1641_v36 = vsel %vm829_vm6, 1.0, %v1439_v0  ;;  %vm832_vm9 = vcmp.lt.s32.totalorder %v815_v34, %v1588_v10 }
 0x16d   :  { %v559_v38 = vpop.permute.xlu1 %558  ;;  %v584_v43 = vpop.permute.xlu0 %583 }
 0x16e   :  { %1243 = vmatmul.mubr.bf16.vlgmr.msra.gmra.mrb[0].mxu1 %v633_v37  ;;  %v620_v40 = vmul.f32 %v559_v38, %v293_v17  ;;  %v625_v51 = vmul.f32 %v584_v43, %v312_v23 }
 0x171   :  { %v564_v39 = vpop.permute.xlu1 %563  ;;  %v594_v48 = vpop.permute.xlu0 %593 }
 0x172   :  { %v621_v41 = vmul.f32 %v564_v39, %v296_v19  ;;  %v627_v56 = vmul.f32 %v1221_v22, %v594_v48  ;;  %v1619_v22 = vsel %vm827_vm4, 1.0, %v1439_v0  ;;  %v816_v39 = vadd.s32 72, %v1582_v8 }
 0x173   :  { %v818_v48 = vadd.s32 88, %v1582_v8 }
 0x174   :  { %v634_v42 = vpack.c.bf16 %v621_v41, %v620_v40  ;;  %v1650_v40 = vsel %vm830_vm7, 1.0, %v1439_v0  ;;  %vm833_vm10 = vcmp.lt.s32.totalorder %v816_v39, %v1588_v10 }
 0x175   :  { %v569_v44 = vpop.permute.xlu1 %568  ;;  %v604_v54 = vpop.permute.xlu0 %603  ;;  %vm835_vm12 = vcmp.lt.s32.totalorder %v818_v48, %v1588_v10 }
 0x176   :  { %1246 = vmatprep.mubr.bf16.mxu1 %v634_v42  ;;  %v622_v46 = vmul.f32 %v1216_v16, %v569_v44  ;;  %v629_v60 = vmul.f32 %v604_v54, %v328_v27  ;;  %v1604_v16 = vsel %vm825_vm2, 1.0, %v1439_v0  ;;  %v811_v27 = vadd.s32 32, %v1582_v8 }
 0x177   :  { %v817_v44 = vadd.s32 80, %v1582_v8 }
 0x178   :  { %vm828_vm5 = vcmp.lt.s32.totalorder %v811_v27, %v1588_v10 }
 0x179   :  { %v574_v45 = vpop.permute.xlu1 %573  ;;  %v614_v62 = vpop.permute.xlu0 %613  ;;  %v1632_v32 = vsel %vm828_vm5, 1.0, %v1439_v0  ;;  %vm834_vm11 = vcmp.lt.s32.totalorder %v817_v44, %v1588_v10 }
 0x17a   :  { %v623_v47 = vmul.f32 %v1217_v18, %v574_v45  ;;  %v631_v2 = vmul.f32 %v1225_v26, %v614_v62  ;;  %v1610_v18 = vsel %vm826_vm3, 1.0, %v1439_v0  ;;  %v1659_v45 = vsel %vm831_vm8, 1.0, %v1439_v0 }
 0x17c   :  { %v635_v49 = vpack.c.bf16 %v623_v47, %v622_v46 }
 0x17d   :  { %v579_v50 = vpop.permute.xlu1 %578 }
 0x17e   :  { %v624_v52 = vmul.f32 %v579_v50, %v309_v21  ;;  %1247 = vmatmul.mubr.bf16.gmra.mrb[4].mxu1 %v635_v49  ;;  %v1666_v49 = vsel %vm832_vm9, 1.0, %v1439_v0 }
 0x180   :  { %v636_v53 = vpack.c.bf16 %v625_v51, %v624_v52 }
 0x181   :  { %v589_v55 = vpop.permute.xlu1 %588 }
 0x182   :  { %v626_v57 = vmul.f32 %v1220_v20, %v589_v55  ;;  %1250 = vmatprep.mubr.bf16.mxu1 %v636_v53  ;;  %v819_v53 = vadd.s32 96, %v1582_v8  ;;  %v1673_v55 = vsel %vm833_vm10, 1.0, %v1439_v0 }
 0x184   :  { %v637_v58 = vpack.c.bf16 %v627_v56, %v626_v57  ;;  %vm836_vm13 = vcmp.lt.s32.totalorder %v819_v53, %v1588_v10 }
 0x185   :  { %v599_v59 = vpop.permute.xlu1 %598  ;;  %v1691_v6 = vsel %vm836_vm13, 1.0, %v1439_v0 }
 0x186   :  { %v628_v61 = vmul.f32 %v599_v59, %v325_v25  ;;  %1251 = vmatmul.mubr.bf16.gmra.mrb[8].mxu1 %v637_v58  ;;  %v820_v59 = vadd.s32 104, %v1582_v8 }
 0x188   :  { %v638_v63 = vpack.c.bf16 %v629_v60, %v628_v61  ;;  %v1679_v60 = vsel %vm834_vm11, 1.0, %v1439_v0  ;;  %vm837_vm14 = vcmp.lt.s32.totalorder %v820_v59, %v1588_v10 }
 0x189   :  { %v609_v1 = vpop.permute.xlu1 %608 }
 0x18a   :  { %v630_v3 = vmul.f32 %v1224_v24, %v609_v1  ;;  %1254 = vmatprep.mubr.bf16.mxu1 %v638_v63  ;;  %v821_v1 = vadd.s32 112, %v1582_v8 }
 0x18c   :  { %v639_v4 = vpack.c.bf16 %v631_v2, %v630_v3  ;;  %v1685_v2 = vsel %vm835_vm12, 1.0, %v1439_v0  ;;  %vm838_vm15 = vcmp.lt.s32.totalorder %v821_v1, %v1588_v10 }
 0x18e   :  { %1255 = vmatmul.mubr.bf16.gmra.mrb[12].mxu1 %v639_v4 }
 0x241   :  { %v1595_v13 = vpop.f32.mrb[0].mxu1 }
 0x242   :  { %v1598_v14 = vpop.f32.mrb[1].mxu1  ;;  %v874_v23 = vmul.f32 %v1595_v13, %v1610_v18 }
 0x243   :  { %v1606_v17 = vpop.f32.mrb[2].mxu1  ;;  %v872_v20 = vmul.f32 %v1601_v15, %v1598_v14 }
 0x244   :  { %v1612_v19 = vpop.f32.mrb[3].mxu1  ;;  %v875_v25 = vmul.f32 %v1606_v17, %v1619_v22 }
 0x245   :  { %v873_v21 = vmul.f32 %v1604_v16, %v1612_v19 }
 0x247   :  { %v888_v24 = vadd.f32 %v873_v21, %v872_v20  ;;  %v1696_v20 = vsel %vm837_vm14, 1.0, %v1439_v0 }
 0x249   :  { %v889_v26 = vadd.f32 %v888_v24, %v874_v23 }
 0x24b   :  { %v890_v28 = vadd.f32 %v889_v26, %v875_v25  ;;  %v1701_v25 = vsel %vm838_vm15, 1.0, %v1439_v0 }
 0x251   :  { %v1634_v33 = vpop.f32.mrb[4].mxu1 }
 0x252   :  { %v1638_v35 = vpop.f32.mrb[5].mxu1  ;;  %v878_v46 = vmul.f32 %v1634_v33, %v1650_v40 }
 0x253   :  { %v876_v37 = vmul.f32 %v1632_v32, %v1638_v35  ;;  %v1645_v38 = vpop.f32.mrb[6].mxu1 }
 0x254   :  { %v1652_v41 = vpop.f32.mrb[7].mxu1  ;;  %v879_v50 = vmul.f32 %v1645_v38, %v1659_v45 }
 0x255   :  { %v891_v42 = vadd.f32 %v890_v28, %v876_v37  ;;  %v877_v43 = vmul.f32 %v1641_v36, %v1652_v41 }
 0x257   :  { %v892_v47 = vadd.f32 %v891_v42, %v877_v43 }
 0x259   :  { %v893_v51 = vadd.f32 %v892_v47, %v878_v46  ;;  %v1252_v52 = vpop.f32.mrb[8].mxu1  ;;  %v909_v47 = vstv %s1709_s0 }
 0x25a   :  { %v770_v54 = vpop.f32.mrb[9].mxu1  ;;  %v882_v3 = vmul.f32 %v1252_v52, %v1679_v60 }
 0x25b   :  { %v880_v56 = vmul.f32 %v1666_v49, %v770_v54  ;;  %v894_v57 = vadd.f32 %v893_v51, %v879_v50  ;;  %v1253_v58 = vpop.f32.mrb[10].mxu1 }
 0x25c   :  { %v773_v61 = vpop.f32.mrb[11].mxu1  ;;  %v883_v7 = vmul.f32 %v1253_v58, %v1685_v2 }
 0x25d   :  { %v895_v62 = vadd.f32 %v894_v57, %v880_v56  ;;  %v881_v63 = vmul.f32 %v1673_v55, %v773_v61 }
 0x25f   :  { %v896_v4 = vadd.f32 %v895_v62, %v881_v63 }
 0x261   :  { %v897_v9 = vadd.f32 %v896_v4, %v882_v3  ;;  %v1256_v11 = vpop.f32.mrb[12].mxu1 }
 0x262   :  { %v786_v12 = vpop.f32.mrb[13].mxu1  ;;  %v886_v30 = vmul.f32 %v1256_v11, %v1701_v25 }
 0x263   :  { %v884_v21 = vmul.f32 %v1691_v6, %v786_v12  ;;  %v898_v23 = vadd.f32 %v897_v9, %v883_v7  ;;  %v1257_v24 = vpop.f32.mrb[14].mxu1 }
 0x264   :  { %v789_v26 = vpop.f32.mrb[15].mxu1  ;;  %v887_v34 = vmul.f32 %v1257_v24, %v1705_v29 }
 0x265   :  { %v899_v27 = vadd.f32 %v898_v23, %v884_v21  ;;  %v885_v28 = vmul.f32 %v1696_v20, %v789_v26 }
 0x267   :  { %v900_v31 = vadd.f32 %v899_v27, %v885_v28 }
 0x269   :  { %v901_v37 = vadd.f32 %v900_v31, %v886_v30 }
 0x26b   :  { %v902_v39 = vadd.f32 %v901_v37, %v887_v34 }
 0x26d   :  { %v903_v42 = vrot.slane %v902_v39, 4 }
 0x26f   :  { %v904_v43 = vadd.f32 %v903_v42, %v902_v39 }
 0x271   :  { %v905_v10 = vrot.slane %v904_v43, 2 }
 0x273   :  { %v906_v44 = vadd.f32 %v905_v10, %v904_v43 }
 0x275   :  { %v907_v46 = vrot.slane %v906_v44, 1 }
 0x277   :  { %v908_v48 = vadd.f32 %v907_v46, %v906_v44 }
 0x279   :  { %v910_v0 = vmul.f32 %v909_v47, %v908_v48 }
 0x27b   :  { %v1715_v50 = vsub.f32 %v1598_v14, %v910_v0  ;;  %v1718_v51 = vsub.f32 %v1612_v19, %v910_v0  ;;  %v1721_v53 = vsub.f32 %v1595_v13, %v910_v0  ;;  %v1724_v56 = vsub.f32 %v1606_v17, %v910_v0 }
 0x27c   :  { %v1727_v57 = vsub.f32 %v1638_v35, %v910_v0  ;;  %v1730_v59 = vsub.f32 %v1652_v41, %v910_v0  ;;  %v1733_v62 = vsub.f32 %v1634_v33, %v910_v0  ;;  %v1736_v14 = vsub.f32 %v1645_v38, %v910_v0 }
 0x27d   :  { %v1738_v19 = vsub.f32 %v770_v54, %v910_v0  ;;  %v1740_v63 = vsub.f32 %v773_v61, %v910_v0  ;;  %v1742_v13 = vsub.f32 %v1252_v52, %v910_v0  ;;  %v1744_v17 = vsub.f32 %v1253_v58, %v910_v0 }
 0x27e   :  { %v1746_v1 = vsub.f32 %v786_v12, %v910_v0  ;;  %v1748_v35 = vsub.f32 %v789_v26, %v910_v0  ;;  %v1750_v41 = vsub.f32 %v1256_v11, %v910_v0  ;;  %v1752_v3 = vsub.f32 %v1257_v24, %v910_v0 }
 0x27f   :  { %v927_v33 = vmul.f32 %v1715_v50, %v1715_v50  ;;  %v928_v38 = vmul.f32 %v1718_v51, %v1718_v51  ;;  %v929_v52 = vmul.f32 %v1721_v53, %v1721_v53  ;;  %v930_v61 = vmul.f32 %v1724_v56, %v1724_v56 }
 0x280   :  { %v931_v4 = vmul.f32 %v1727_v57, %v1727_v57  ;;  %v932_v9 = vmul.f32 %v1730_v59, %v1730_v59  ;;  %v934_v23 = vmul.f32 %v1736_v14, %v1736_v14  ;;  %v942_v0 = vmul.f32 %v1752_v3, %v1752_v3 }
 0x281   :  { %v943_v54 = vmul.f32 %v1601_v15, %v927_v33  ;;  %v944_v58 = vmul.f32 %v1604_v16, %v928_v38  ;;  %v945_v5 = vmul.f32 %v1610_v18, %v929_v52  ;;  %v946_v11 = vmul.f32 %v1619_v22, %v930_v61 }
 0x282   :  { %v933_v15 = vmul.f32 %v1733_v62, %v1733_v62  ;;  %v947_v16 = vmul.f32 %v1632_v32, %v931_v4  ;;  %v948_v24 = vmul.f32 %v1641_v36, %v932_v9  ;;  %v935_v18 = vmul.f32 %v1738_v19, %v1738_v19 }
 0x283   :  { %v959_v7 = vadd.f32 %v944_v58, %v943_v54  ;;  %v936_v22 = vmul.f32 %v1740_v63, %v1740_v63  ;;  %v950_v30 = vmul.f32 %v1659_v45, %v934_v23  ;;  %v937_v32 = vmul.f32 %v1742_v13, %v1742_v13 }
 0x284   :  { %v949_v27 = vmul.f32 %v1650_v40, %v933_v15  ;;  %v951_v34 = vmul.f32 %v1666_v49, %v935_v18  ;;  %v938_v36 = vmul.f32 %v1744_v17, %v1744_v17  ;;  %v939_v40 = vmul.f32 %v1746_v1, %v1746_v1 }
 0x285   :  { %v960_v12 = vadd.f32 %v959_v7, %v945_v5  ;;  %v952_v39 = vmul.f32 %v1673_v55, %v936_v22  ;;  %v953_v43 = vmul.f32 %v1679_v60, %v937_v32  ;;  %v940_v45 = vmul.f32 %v1748_v35, %v1748_v35 }
 0x286   :  { %v954_v44 = vmul.f32 %v1685_v2, %v938_v36  ;;  %v941_v49 = vmul.f32 %v1750_v41, %v1750_v41  ;;  %v955_v48 = vmul.f32 %v1691_v6, %v939_v40  ;;  %v958_v54 = vmul.f32 %v1705_v29, %v942_v0 }
 0x287   :  { %v961_v21 = vadd.f32 %v960_v12, %v946_v11  ;;  %v956_v33 = vmul.f32 %v1696_v20, %v940_v45  ;;  %v1002_v20 = vsub.s32 0, %v1582_v8  ;;  %v1022_v15 = vsub.s32 1, %v1582_v8 }
 0x288   :  { %v957_v38 = vmul.f32 %v1701_v25, %v941_v49  ;;  %v999_v25 = vld [vmem:[%s1867_s4] sm:$0x3]  ;;  %s1441_s4 = smov [#allocation12]  }
 0x289   :  { %v962_v26 = vadd.f32 %v961_v21, %v947_v16  ;;  %v1003_v16 = vrot.slane %v999_v25, %v1002_v20  ;;  %v1023_v21 = vrot.slane %v999_v25, %v1022_v15  ;;  %s1825_s10 = sshll.u32 %s1441_s4, 4  ;;  %s1838_s10 = int_to_ptr.vmem [resolvable:$true] %s1825_s10 }
 0x28a   :  { %s1406_s11 = scalar_lea.vmem %s1838_s10, 2048  ;;  %p1411_p11 = scmp.lt.s32.totalorder %s1838_s10, %s1838_s10 }
 0x28b   :  { %v963_v28 = vadd.f32 %v962_v26, %v948_v24  ;;  %p1407_p10 = scmp.ne.s32.totalorder %s1838_s10, %s1406_s11  ;;  %p1412_p12 = scmp.lt.s32.totalorder %s1406_s11, %s1406_s11 }
 0x28d   :  { %v964_v31 = vadd.f32 %v963_v28, %v949_v27  ;;  %p1413_p13 = por %p1412_p12, %p1411_p11 }
 0x28f   :  { %v965_v37 = vadd.f32 %v964_v31, %v950_v30  ;;  %p1414_p0 = pnand %p1413_p13, %p1407_p10 }
 0x291   :  { %v966_v42 = vadd.f32 %v965_v37, %v951_v34 }
 0x293   :  { %v967_v10 = vadd.f32 %v966_v42, %v952_v39 }
 0x295   :  { %v968_v46 = vadd.f32 %v967_v10, %v953_v43 }
 0x297   :  { %v969_v55 = vadd.f32 %v968_v46, %v954_v44 }
 0x299   :  { %v970_v60 = vadd.f32 %v969_v55, %v955_v48 }
 0x29b   :  { %v971_v52 = vadd.f32 %v970_v60, %v956_v33 }
 0x29d   :  { %v972_v2 = vadd.f32 %v971_v52, %v957_v38 }
 0x29f   :  { %v973_v58 = vadd.f32 %v972_v2, %v958_v54 }
 0x2a1   :  { %v974_v61 = vrot.slane %v973_v58, 4 }
 0x2a3   :  { %v975_v4 = vadd.f32 %v974_v61, %v973_v58 }
 0x2a5   :  { %v976_v5 = vrot.slane %v975_v4, 2 }
 0x2a7   :  { %v977_v7 = vadd.f32 %v976_v5, %v975_v4 }
 0x2a9   :  { %v978_v6 = vrot.slane %v977_v7, 1 }
 0x2ab   :  { %v979_v9 = vadd.f32 %v978_v6, %v977_v7 }
 0x2ad   :  { %v980_v11 = vmul.f32 %v979_v9, %v909_v47 }
 0x2af   :  { %v981_v12 = vadd.f32 1e-05, %v980_v11 }
 0x2b1   :  { %1338 = vrsqrt.f32 %v981_v12 }
 0x2bb   :  { %v1339_v29 = vpop.eup %1338 }
 0x2bc   :  { %v983_v23 = vmul.f32 %v1339_v29, %v1715_v50  ;;  %v984_v24 = vmul.f32 %v1339_v29, %v1718_v51  ;;  %v985_v26 = vmul.f32 %v1339_v29, %v1721_v53  ;;  %v986_v47 = vmul.f32 %v1339_v29, %v1724_v56 }
 0x2bd   :  { %v987_v18 = vmul.f32 %v1339_v29, %v1727_v57  ;;  %v988_v27 = vmul.f32 %v1339_v29, %v1730_v59  ;;  %v989_v8 = vmul.f32 %v1339_v29, %v1733_v62  ;;  %v990_v28 = vmul.f32 %v1339_v29, %v1736_v14 }
 0x2be   :  { %v991_v22 = vmul.f32 %v1339_v29, %v1738_v19  ;;  %v992_v30 = vmul.f32 %v1339_v29, %v1740_v63  ;;  %v993_v50 = vmul.f32 %v1339_v29, %v1742_v13  ;;  %v994_v51 = vmul.f32 %v1339_v29, %v1744_v17 }
 0x2bf   :  { %v995_v53 = vmul.f32 %v1339_v29, %v1746_v1  ;;  %v996_v56 = vmul.f32 %v1339_v29, %v1748_v35  ;;  %v997_v57 = vmul.f32 %v1339_v29, %v1750_v41  ;;  %v998_v59 = vmul.f32 %v1339_v29, %v1752_v3 }
 0x2c0   :  { %v1004_v31 = vmul.f32 %v1003_v16, %v983_v23  ;;  %v1005_v62 = vmul.f32 %v1003_v16, %v984_v24  ;;  %v1006_v32 = vmul.f32 %v1003_v16, %v985_v26  ;;  %v1007_v14 = vmul.f32 %v1003_v16, %v986_v47 }
 0x2c1   :  { %v1008_v34 = vmul.f32 %v1003_v16, %v987_v18  ;;  %v1009_v19 = vmul.f32 %v1003_v16, %v988_v27  ;;  %v1010_v37 = vmul.f32 %v1003_v16, %v989_v8  ;;  %v1011_v63 = vmul.f32 %v1003_v16, %v990_v28 }
 0x2c2   :  { %v1012_v36 = vmul.f32 %v1003_v16, %v991_v22  ;;  %v1013_v13 = vmul.f32 %v1003_v16, %v992_v30  ;;  %v1014_v39 = vmul.f32 %v1003_v16, %v993_v50  ;;  %v1015_v17 = vmul.f32 %v1003_v16, %v994_v51 }
 0x2c3   :  { %v1016_v42 = vmul.f32 %v1003_v16, %v995_v53  ;;  %v1017_v1 = vmul.f32 %v1003_v16, %v996_v56  ;;  %v1018_v40 = vmul.f32 %v1003_v16, %v997_v57  ;;  %v1019_v35 = vmul.f32 %v1003_v16, %v998_v59 }
 0x2c4   :  { %v1024_v43 = vadd.f32 %v1023_v21, %v1004_v31  ;;  %v1025_v41 = vadd.f32 %v1023_v21, %v1005_v62  ;;  %v1026_v10 = vadd.f32 %v1023_v21, %v1006_v32  ;;  %v1027_v3 = vadd.f32 %v1023_v21, %v1007_v14 }
 0x2c5   :  { %v1028_v45 = vadd.f32 %v1023_v21, %v1008_v34  ;;  %v1029_v44 = vadd.f32 %v1023_v21, %v1009_v19  ;;  %v1030_v46 = vadd.f32 %v1023_v21, %v1010_v37  ;;  %v1031_v49 = vadd.f32 %v1023_v21, %v1011_v63 }
 0x2c6   :  { %v1032_v48 = vadd.f32 %v1023_v21, %v1012_v36  ;;  %v1033_v55 = vadd.f32 %v1023_v21, %v1013_v13  ;;  %v1034_v0 = vadd.f32 %v1023_v21, %v1014_v39  ;;  %v1035_v33 = vadd.f32 %v1023_v21, %v1015_v17 }
 0x2c7   :  { %v1036_v60 = vadd.f32 %v1023_v21, %v1016_v42  ;;  %v1037_v38 = vadd.f32 %v1023_v21, %v1017_v1  ;;  %v1038_v52 = vadd.f32 %v1023_v21, %v1018_v40  ;;  %v1039_v54 = vadd.f32 %v1023_v21, %v1019_v35 }
 0x2c8   :  { %vm1040_vm1 = vcmp.ge.f32.partialorder %v1024_v43, 0.0  ;;  %vm1041_vm2 = vcmp.ge.f32.partialorder %v1025_v41, 0.0  ;;  %vm1042_vm3 = vcmp.ge.f32.partialorder %v1026_v10, 0.0  ;;  %vm1043_vm4 = vcmp.ge.f32.partialorder %v1027_v3, 0.0 }
 0x2c9   :  { %vm1044_vm5 = vcmp.ge.f32.partialorder %v1028_v45, 0.0  ;;  %vm1045_vm6 = vcmp.ge.f32.partialorder %v1029_v44, 0.0  ;;  %vm1046_vm7 = vcmp.ge.f32.partialorder %v1030_v46, 0.0  ;;  %vm1047_vm8 = vcmp.ge.f32.partialorder %v1031_v49, 0.0 }
 0x2ca   :  { %vm1048_vm9 = vcmp.ge.f32.partialorder %v1032_v48, 0.0  ;;  %vm1049_vm10 = vcmp.ge.f32.partialorder %v1033_v55, 0.0  ;;  %vm1050_vm11 = vcmp.ge.f32.partialorder %v1034_v0, 0.0  ;;  %vm1051_vm12 = vcmp.ge.f32.partialorder %v1035_v33, 0.0 }
 0x2cb   :  { %vm1052_vm13 = vcmp.ge.f32.partialorder %v1036_v60, 0.0  ;;  %vm1053_vm14 = vcmp.ge.f32.partialorder %v1037_v38, 0.0  ;;  %vm1054_vm15 = vcmp.ge.f32.partialorder %v1038_v52, 0.0  ;;  %vm1055_vm0 = vcmp.ge.f32.partialorder %v1039_v54, 0.0 }
 0x2cc   :  { %v1056_v2 = vmul.f32 0.01, %v1024_v43  ;;  %v1057_v58 = vmul.f32 0.01, %v1025_v41  ;;  %v1058_v61 = vmul.f32 0.01, %v1026_v10 }
 0x2cd   :  { %v1059_v4 = vmul.f32 0.01, %v1027_v3  ;;  %v1060_v5 = vmul.f32 0.01, %v1028_v45  ;;  %v1061_v7 = vmul.f32 0.01, %v1029_v44 }
 0x2ce   :  { %v1062_v6 = vmul.f32 0.01, %v1030_v46  ;;  %v1063_v9 = vmul.f32 0.01, %v1031_v49  ;;  %v1064_v11 = vmul.f32 0.01, %v1032_v48  ;;  %v1072_v12 = vsel %vm1040_vm1, %v1024_v43, %v1056_v2 }
 0x2cf   :  { %v1065_v20 = vmul.f32 0.01, %v1033_v55  ;;  %v1066_v15 = vmul.f32 0.01, %v1034_v0  ;;  %v1067_v25 = vmul.f32 0.01, %v1035_v33  ;;  %v1073_v29 = vsel %vm1041_vm2, %v1025_v41, %v1057_v58 }
 0x2d0   :  { %1088 = vst [vmem:[#allocation12] sm:$0xff] %v1072_v12  ;;  %v1068_v16 = vmul.f32 0.01, %v1036_v60  ;;  %v1069_v21 = vmul.f32 0.01, %v1037_v38  ;;  %v1074_v24 = vsel %vm1042_vm3, %v1026_v10, %v1058_v61  ;;  %1089 = vst [vmem:[#allocation12 + $0x8] sm:$0xff] %v1073_v29  ;;  %v1075_v47 = vsel %vm1043_vm4, %v1027_v3, %v1059_v4 }
 0x2d1   :  { %v1070_v23 = vmul.f32 0.01, %v1038_v52  ;;  %v1071_v26 = vmul.f32 0.01, %v1039_v54  ;;  %v1076_v18 = vsel %vm1044_vm5, %v1028_v45, %v1060_v5  ;;  %v1077_v27 = vsel %vm1045_vm6, %v1029_v44, %v1061_v7  ;;  %1090 = vst [vmem:[#allocation12 + $0x10] sm:$0xff] %v1074_v24  ;;  %1091 = vst [vmem:[#allocation12 + $0x18] sm:$0xff] %v1075_v47 }
 0x2d2   :  { %v1078_v8 = vsel %vm1046_vm7, %v1030_v46, %v1062_v6  ;;  %v1079_v28 = vsel %vm1047_vm8, %v1031_v49, %v1063_v9  ;;  %v1080_v22 = vsel %vm1048_vm9, %v1032_v48, %v1064_v11  ;;  %v1081_v30 = vsel %vm1049_vm10, %v1033_v55, %v1065_v20  ;;  %1092 = vst [vmem:[#allocation12 + $0x20] sm:$0xff] %v1076_v18 }
 0x2d3   :  { %1093 = vst [vmem:[#allocation12 + $0x28] sm:$0xff] %v1077_v27  ;;  %v1082_v50 = vsel %vm1050_vm11, %v1034_v0, %v1066_v15  ;;  %v1083_v51 = vsel %vm1051_vm12, %v1035_v33, %v1067_v25  ;;  %v1084_v53 = vsel %vm1052_vm13, %v1036_v60, %v1068_v16  ;;  %v1085_v56 = vsel %vm1053_vm14, %v1037_v38, %v1069_v21 }
 0x2d4   :  { %1094 = vst [vmem:[#allocation12 + $0x30] sm:$0xff] %v1078_v8  ;;  %1095 = vst [vmem:[#allocation12 + $0x38] sm:$0xff] %v1079_v28  ;;  %v1086_v57 = vsel %vm1054_vm15, %v1038_v52, %v1070_v23  ;;  %v1087_v59 = vsel %vm1055_vm0, %v1039_v54, %v1071_v26 }
 0x2d5   :  { %1096 = vst [vmem:[#allocation12 + $0x40] sm:$0xff] %v1080_v22  ;;  %1097 = vst [vmem:[#allocation12 + $0x48] sm:$0xff] %v1081_v30 }
 0x2d6   :  { %1098 = vst [vmem:[#allocation12 + $0x50] sm:$0xff] %v1082_v50  ;;  %1099 = vst [vmem:[#allocation12 + $0x58] sm:$0xff] %v1083_v51 }
 0x2d7   :  { %1100 = vst [vmem:[#allocation12 + $0x60] sm:$0xff] %v1084_v53  ;;  %1101 = vst [vmem:[#allocation12 + $0x68] sm:$0xff] %v1085_v56 }
 0x2d8   :  { %1102 = vst [vmem:[#allocation12 + $0x70] sm:$0xff] %v1086_v57  ;;  %1103 = vst [vmem:[#allocation12 + $0x78] sm:$0xff] %v1087_v59 }
 0x2d9   :  { %1417 = shalt.err (!%p1414_p0)
}
 0x2da   :  { %s1418_s14 = scalar_lea.hbm %s1868_s5, 2048 }
 0x2db   :  { %p1419_p1 = scmp.ne.s32.totalorder %s1868_s5, %s1418_s14  ;;  %p1422_p2 = scmp.lt.u32.totalorder %s1418_s14, %s1868_s5 }
 0x2dd   :  { %p1424_p3 = pnand %p1422_p2, %p1419_p1 }
 0x2df   :  { %1427 = shalt.err (!%p1424_p3)
}
 0x2e0   :  { %s1442_s18 = smov 128   ;;  %s1443_s19 = smov 8  }
 0x2e1   :  { %1115 = dma.vmem_to_hbm [thread:$0]  %s1838_s10, 2048, %s1868_s5, [#allocation8], %s1442_s18, %s1442_s18, %s1443_s19  }
 0x2e2   :  { %1432 = dma.done.wait [#allocation8], 2048  }
 0x2e3   :  { %1433 = vsyncadd [#allocation8], 4294965248 }
 0x2e4   :  { %1119 = vsyncpa [#allocation7], 1 }
 0x2e5   :  { %1120 = vsyncpa [#allocation10], 1 }
 0x2e6   :  { %1121 = vsyncpa [#allocation8], 1 }

</bundles_post_ra>
